<compile_context>
chip_gen: v7x
topology: tpu7x:2x2x1
jax: 0.10.0
libtpu: 0.0.40
codegen_flags: <defaults>
</compile_context>

<pallas_src>
import functools

import jax
import jax.numpy as jnp
from jax.experimental import pallas as pl
from jax.experimental.pallas import tpu as pltpu


# --------------------------- fused Pallas kernel -----------------------------

def _make_gnn_kernel(num_layers):
    """Fused forward for one graph-block (all GIN layers + pool + head + lsm).

    Per GIN layer (train_eps=False -> eps=0, aggr='add'), BN pre-folded and
    A_hat = A + I:
        agg = A_hat @ h
        z   = relu(agg @ W1' + b1')      # Lin -> BN(eval, folded) -> ReLU
        h   = relu(z   @ W2' + b2')      # Lin -> outer BN(folded) -> ReLU
    Then: pooled = P @ h ; logits = pooled @ Wp + bp ; log_softmax.
    """

    def kernel(*refs):
        x_ref, a_ref, p_ref = refs[0], refs[1], refs[2]
        w_refs = refs[3:3 + 4 * num_layers]
        wp_ref, bp_ref, out_ref = refs[3 + 4 * num_layers:]

        a = a_ref[0]                      # (N, N) adjacency + I, matmul dtype
        mm = a.dtype                      # matmul operand dtype (f32 or bf16)
        h = x_ref[0]                      # (N, Cin), matmul dtype

        for l in range(num_layers):       # static unroll; h never leaves VMEM
            w1 = w_refs[4 * l + 0][...]
            b1 = w_refs[4 * l + 1][...]   # biases kept f32 (VPU path)
            w2 = w_refs[4 * l + 2][...]
            b2 = w_refs[4 * l + 3][...]
            agg = jnp.dot(a, h.astype(mm), preferred_element_type=jnp.float32)
            z = jnp.dot(agg.astype(mm), w1,
                        preferred_element_type=jnp.float32) + b1
            z = jnp.maximum(z, 0.0)                       # f32
            z = jnp.dot(z.astype(mm), w2,
                        preferred_element_type=jnp.float32) + b2
            h = jnp.maximum(z, 0.0)                       # f32

        # mean graph pooling (P is a row-normalized one-hot of `batch`) + head
        pooled = jnp.dot(p_ref[0], h.astype(mm),
                         preferred_element_type=jnp.float32)
        logits = jnp.dot(pooled.astype(mm), wp_ref[...],
                         preferred_element_type=jnp.float32) + bp_ref[...]

        # log_softmax over the real (unpadded) class axis, f32 throughout
        m = jnp.max(logits, axis=-1, keepdims=True)
        zc = logits - m
        lse = jnp.log(jnp.sum(jnp.exp(zc), axis=-1, keepdims=True))
        out_ref[0] = zc - lse

    return kernel


# ------------------------------- wrapper --------------------------------------

def gnn_forward(x, a, p, layers, wp, bp, *, matmul_dtype=jnp.float32):
    """Batched fused GNN forward.

    x:  [B, N, Cin]  node features, one block of N nodes per batch element
    a:  [B, N, N]    dense adjacency per block (no self loops)
    p:  [B, G, N]    mean-pooling matrix per block (row-normalized one-hot)
    layers: list of (w1, b1, s1, t1, w2, b2, so, to); weights in x@W+b layout
    wp: [H, OUT], bp: [1, OUT]
    Returns log-probs [B, G, OUT] (f32).
    """
    b_blocks, n, cin = x.shape
    g = p.shape[1]
    out_c = wp.shape[1]
    num_layers = len(layers)

    # --- host-side folding + dtype casts (fused under jit, done once) -------
    a_hat = (a + jnp.eye(n, dtype=a.dtype)).astype(matmul_dtype)  # GIN eps=0
    x_mm = x.astype(matmul_dtype)
    p_mm = p.astype(matmul_dtype)

    flat_w = []
    for (w1, b1, s1, t1, w2, b2, so, to) in layers:
        flat_w.append((w1 * s1).astype(matmul_dtype))          # fold MLP BN
        flat_w.append((b1 * s1 + t1).astype(jnp.float32))
        flat_w.append((w2 * so).astype(matmul_dtype))          # fold outer BN
        flat_w.append((b2 * so + to).astype(jnp.float32))
    wp_mm = wp.astype(matmul_dtype)
    bp_f32 = bp.astype(jnp.float32)

    weight_args = (*flat_w, wp_mm, bp_f32)
    args = (x_mm, a_hat, p_mm, *weight_args)

    # per-block inputs march with the grid; weights use a constant index_map
    # so they are fetched once and stay resident in VMEM across all B steps
    in_specs = [
        pl.BlockSpec((1, n, cin), lambda i: (i, 0, 0)),
        pl.BlockSpec((1, n, n), lambda i: (i, 0, 0)),
        pl.BlockSpec((1, g, n), lambda i: (i, 0, 0)),
    ]
    for arr in weight_args:
        in_specs.append(
            pl.BlockSpec(arr.shape, lambda i, nd=arr.ndim: (0,) * nd))

    return pl.pallas_call(
        _make_gnn_kernel(num_layers),
        grid=(b_blocks,),
        in_specs=in_specs,
        out_specs=pl.BlockSpec((1, g, out_c), lambda i: (i, 0, 0)),
        out_shape=jax.ShapeDtypeStruct((b_blocks, g, out_c), jnp.float32),
        compiler_params=pltpu.CompilerParams(
            # independent graph-blocks: shard across v7x's two TensorCores
            dimension_semantics=("parallel",)),
    )(*args)


# --------------------------- reference (pure JAX) -----------------------------

def _reference(x, a, p, layers, wp, bp):
    def one_block(xb, ab, pb):
        h = xb
        for (w1, b1, s1, t1, w2, b2, so, to) in layers:
            agg = ab @ h + h                                   # (A + I) @ h
            z = jnp.maximum((agg @ w1 + b1) * s1 + t1, 0.0)
            z = z @ w2 + b2
            h = jnp.maximum(z * so + to, 0.0)
        pooled = pb @ h
        logits = pooled @ wp + bp
        return jax.nn.log_softmax(logits, axis=-1)

    return jax.vmap(one_block)(x, a, p)


# ------------------------------- main -----------------------------------------

if __name__ == "__main__":
    B, N, CIN, H, OUT, G, L = 8, 16, 8, 32, 4, 2, 2

    key = jax.random.PRNGKey(0)
    keys = iter(jax.random.split(key, 64))

    # node features, one block of N nodes per batch element
    x = jax.random.normal(next(keys), (B, N, CIN), jnp.float32)

    # deterministic undirected adjacency per block (no self loops)
    au = (jax.random.uniform(next(keys), (B, N, N)) < 0.3).astype(jnp.float32)
    a = jnp.triu(au, 1)
    a = a + jnp.swapaxes(a, -1, -2)

    # batch assignment within a block: first N//2 nodes -> graph 0, rest -> 1
    batch = jnp.concatenate(
        [jnp.zeros(N // 2, jnp.int32), jnp.ones(N // 2, jnp.int32)])
    onehot = jax.nn.one_hot(batch, G, dtype=jnp.float32).T        # [G, N]
    p_one = onehot / jnp.sum(onehot, axis=1, keepdims=True)       # mean pooling
    p = jnp.broadcast_to(p_one, (B, G, N))

    def bn_affine(k, c):
        # eval-mode BatchNorm1d folded to per-channel affine: y = x * s + t
        k1, k2, k3, k4 = jax.random.split(k, 4)
        gamma = 1.0 + 0.1 * jax.random.normal(k1, (c,), jnp.float32)
        beta = 0.1 * jax.random.normal(k2, (c,), jnp.float32)
        mean = 0.1 * jax.random.normal(k3, (c,), jnp.float32)
        var = jnp.abs(jax.random.normal(k4, (c,), jnp.float32)) + 0.5
        s = gamma * jax.lax.rsqrt(var + 1e-5)
        t = beta - mean * s
        return s.reshape(1, c), t.reshape(1, c)

    # deterministic parameters (weights stored as [in, out], i.e. y = x @ W + b)
    layers = []
    cin = CIN
    for _ in range(L):
        w1 = 0.2 * jax.random.normal(next(keys), (cin, H), jnp.float32)
        b1 = 0.05 * jax.random.normal(next(keys), (1, H), jnp.float32)
        s1, t1 = bn_affine(next(keys), H)     # MLP-internal BatchNorm
        w2 = 0.2 * jax.random.normal(next(keys), (H, H), jnp.float32)
        b2 = 0.05 * jax.random.normal(next(keys), (1, H), jnp.float32)
        so, to = bn_affine(next(keys), H)     # outer self.bns[i] BatchNorm
        layers.append((w1, b1, s1, t1, w2, b2, so, to))
        cin = H

    wp = 0.2 * jax.random.normal(next(keys), (H, OUT), jnp.float32)
    bp = 0.05 * jax.random.normal(next(keys), (1, OUT), jnp.float32)

    ref = _reference(x, a, p, layers, wp, bp)

    # --- f32 matmul path: exact parity with the PyTorch/f32 reference --------
    fwd_f32 = jax.jit(functools.partial(gnn_forward, matmul_dtype=jnp.float32))
    out = jax.block_until_ready(fwd_f32(x, a, p, layers, wp, bp))
    assert out.shape == (B, G, OUT)
    assert jnp.allclose(out, ref, atol=1e-4, rtol=1e-4)

    # --- bf16 matmul-operand path (f32 accumulate): large-N / HBM-bound mode -
    fwd_bf16 = jax.jit(
        functools.partial(gnn_forward, matmul_dtype=jnp.bfloat16))
    out_bf16 = jax.block_until_ready(fwd_bf16(x, a, p, layers, wp, bp))
    assert out_bf16.shape == (B, G, OUT)
    # loose tolerance: operands rounded to bf16, accumulation still f32
    assert jnp.allclose(out_bf16, ref, atol=1e-1, rtol=1e-1)

    print("KERNEL_OK")
</pallas_src>

<mosaic_0001>
module attributes {stable_mosaic.version = 11 : i64} {
  func.func @kernel(%arg0: i32, %arg1: memref<1x16x8xf32, #tpu.memory_space<vmem>>, %arg2: memref<1x16x16xf32, #tpu.memory_space<vmem>>, %arg3: memref<1x2x16xf32, #tpu.memory_space<vmem>>, %arg4: memref<8x32xf32, #tpu.memory_space<vmem>>, %arg5: memref<1x32xf32, #tpu.memory_space<vmem>>, %arg6: memref<32x32xf32, #tpu.memory_space<vmem>>, %arg7: memref<1x32xf32, #tpu.memory_space<vmem>>, %arg8: memref<32x32xf32, #tpu.memory_space<vmem>>, %arg9: memref<1x32xf32, #tpu.memory_space<vmem>>, %arg10: memref<32x32xf32, #tpu.memory_space<vmem>>, %arg11: memref<1x32xf32, #tpu.memory_space<vmem>>, %arg12: memref<32x4xf32, #tpu.memory_space<vmem>>, %arg13: memref<1x4xf32, #tpu.memory_space<vmem>>, %arg14: memref<1x2x4xf32, #tpu.memory_space<vmem>>) attributes {dimension_semantics = [#tpu.dimension_semantics<parallel>], iteration_bounds = array<i64: 8>, scalar_prefetch = 0 : i64, scratch_operands = 0 : i64, tpu.core_type = #tpu.core_type<tc>, window_params = [{transform_indices = @transform_0, window_bounds = array<i64: 1, 16, 8>}, {transform_indices = @transform_1, window_bounds = array<i64: 1, 16, 16>}, {transform_indices = @transform_2, window_bounds = array<i64: 1, 2, 16>}, {pipeline_mode = #tpu.pipeline_mode<synchronous>, transform_indices = @transform_3, window_bounds = array<i64: 8, 32>}, {pipeline_mode = #tpu.pipeline_mode<synchronous>, transform_indices = @transform_4, window_bounds = array<i64: 1, 32>}, {pipeline_mode = #tpu.pipeline_mode<synchronous>, transform_indices = @transform_5, window_bounds = array<i64: 32, 32>}, {pipeline_mode = #tpu.pipeline_mode<synchronous>, transform_indices = @transform_6, window_bounds = array<i64: 1, 32>}, {pipeline_mode = #tpu.pipeline_mode<synchronous>, transform_indices = @transform_7, window_bounds = array<i64: 32, 32>}, {pipeline_mode = #tpu.pipeline_mode<synchronous>, transform_indices = @transform_8, window_bounds = array<i64: 1, 32>}, {pipeline_mode = #tpu.pipeline_mode<synchronous>, transform_indices = @transform_9, window_bounds = array<i64: 32, 32>}, {pipeline_mode = #tpu.pipeline_mode<synchronous>, transform_indices = @transform_10, window_bounds = array<i64: 1, 32>}, {pipeline_mode = #tpu.pipeline_mode<synchronous>, transform_indices = @transform_11, window_bounds = array<i64: 32, 4>}, {pipeline_mode = #tpu.pipeline_mode<synchronous>, transform_indices = @transform_12, window_bounds = array<i64: 1, 4>}, {transform_indices = @transform_13, window_bounds = array<i64: 1, 2, 4>}]} {
    %c0 = arith.constant 0 : index
    %c0_0 = arith.constant 0 : index
    %c0_1 = arith.constant 0 : index
    %0 = vector.load %arg2[%c0, %c0_0, %c0_1] : memref<1x16x16xf32, #tpu.memory_space<vmem>>, vector<1x16x16xf32>
    %1 = vector.shape_cast %0 : vector<1x16x16xf32> to vector<16x16xf32>
    %c0_2 = arith.constant 0 : index
    %c0_3 = arith.constant 0 : index
    %c0_4 = arith.constant 0 : index
    %2 = vector.load %arg1[%c0_2, %c0_3, %c0_4] : memref<1x16x8xf32, #tpu.memory_space<vmem>>, vector<1x16x8xf32>
    %3 = vector.shape_cast %2 : vector<1x16x8xf32> to vector<16x8xf32>
    %c0_5 = arith.constant 0 : index
    %c0_6 = arith.constant 0 : index
    %4 = vector.load %arg4[%c0_5, %c0_6] : memref<8x32xf32, #tpu.memory_space<vmem>>, vector<8x32xf32>
    %c0_7 = arith.constant 0 : index
    %c0_8 = arith.constant 0 : index
    %5 = vector.load %arg5[%c0_7, %c0_8] : memref<1x32xf32, #tpu.memory_space<vmem>>, vector<1x32xf32>
    %c0_9 = arith.constant 0 : index
    %c0_10 = arith.constant 0 : index
    %6 = vector.load %arg6[%c0_9, %c0_10] : memref<32x32xf32, #tpu.memory_space<vmem>>, vector<32x32xf32>
    %c0_11 = arith.constant 0 : index
    %c0_12 = arith.constant 0 : index
    %7 = vector.load %arg7[%c0_11, %c0_12] : memref<1x32xf32, #tpu.memory_space<vmem>>, vector<1x32xf32>
    %cst = arith.constant dense<0.000000e+00> : vector<16x8xf32>
    %8 = tpu.matmul %1, %3, %cst {dimension_numbers = #tpu.dot_dimension_numbers<[1], [0], [0], [1], [0, 0, 1, 1], [], []>} : vector<16x16xf32>, vector<16x8xf32>, vector<16x8xf32> -> vector<16x8xf32>
    %cst_13 = arith.constant dense<0.000000e+00> : vector<16x32xf32>
    %9 = tpu.matmul %8, %4, %cst_13 {dimension_numbers = #tpu.dot_dimension_numbers<[1], [0], [0], [1], [0, 0, 1, 1], [], []>} : vector<16x8xf32>, vector<8x32xf32>, vector<16x32xf32> -> vector<16x32xf32>
    %10 = vector.broadcast %5 : vector<1x32xf32> to vector<16x32xf32>
    %11 = arith.addf %9, %10 : vector<16x32xf32>
    %cst_14 = arith.constant 0.000000e+00 : f32
    %12 = vector.broadcast %cst_14 : f32 to vector<16x32xf32>
    %13 = arith.maximumf %11, %12 : vector<16x32xf32>
    %cst_15 = arith.constant dense<0.000000e+00> : vector<16x32xf32>
    %14 = tpu.matmul %13, %6, %cst_15 {dimension_numbers = #tpu.dot_dimension_numbers<[1], [0], [0], [1], [0, 0, 1, 1], [], []>} : vector<16x32xf32>, vector<32x32xf32>, vector<16x32xf32> -> vector<16x32xf32>
    %15 = vector.broadcast %7 : vector<1x32xf32> to vector<16x32xf32>
    %16 = arith.addf %14, %15 : vector<16x32xf32>
    %cst_16 = arith.constant 0.000000e+00 : f32
    %17 = vector.broadcast %cst_16 : f32 to vector<16x32xf32>
    %18 = arith.maximumf %16, %17 : vector<16x32xf32>
    %c0_17 = arith.constant 0 : index
    %c0_18 = arith.constant 0 : index
    %19 = vector.load %arg8[%c0_17, %c0_18] : memref<32x32xf32, #tpu.memory_space<vmem>>, vector<32x32xf32>
    %c0_19 = arith.constant 0 : index
    %c0_20 = arith.constant 0 : index
    %20 = vector.load %arg9[%c0_19, %c0_20] : memref<1x32xf32, #tpu.memory_space<vmem>>, vector<1x32xf32>
    %c0_21 = arith.constant 0 : index
    %c0_22 = arith.constant 0 : index
    %21 = vector.load %arg10[%c0_21, %c0_22] : memref<32x32xf32, #tpu.memory_space<vmem>>, vector<32x32xf32>
    %c0_23 = arith.constant 0 : index
    %c0_24 = arith.constant 0 : index
    %22 = vector.load %arg11[%c0_23, %c0_24] : memref<1x32xf32, #tpu.memory_space<vmem>>, vector<1x32xf32>
    %cst_25 = arith.constant dense<0.000000e+00> : vector<16x32xf32>
    %23 = tpu.matmul %1, %18, %cst_25 {dimension_numbers = #tpu.dot_dimension_numbers<[1], [0], [0], [1], [0, 0, 1, 1], [], []>} : vector<16x16xf32>, vector<16x32xf32>, vector<16x32xf32> -> vector<16x32xf32>
    %cst_26 = arith.constant dense<0.000000e+00> : vector<16x32xf32>
    %24 = tpu.matmul %23, %19, %cst_26 {dimension_numbers = #tpu.dot_dimension_numbers<[1], [0], [0], [1], [0, 0, 1, 1], [], []>} : vector<16x32xf32>, vector<32x32xf32>, vector<16x32xf32> -> vector<16x32xf32>
    %25 = vector.broadcast %20 : vector<1x32xf32> to vector<16x32xf32>
    %26 = arith.addf %24, %25 : vector<16x32xf32>
    %cst_27 = arith.constant 0.000000e+00 : f32
    %27 = vector.broadcast %cst_27 : f32 to vector<16x32xf32>
    %28 = arith.maximumf %26, %27 : vector<16x32xf32>
    %cst_28 = arith.constant dense<0.000000e+00> : vector<16x32xf32>
    %29 = tpu.matmul %28, %21, %cst_28 {dimension_numbers = #tpu.dot_dimension_numbers<[1], [0], [0], [1], [0, 0, 1, 1], [], []>} : vector<16x32xf32>, vector<32x32xf32>, vector<16x32xf32> -> vector<16x32xf32>
    %30 = vector.broadcast %22 : vector<1x32xf32> to vector<16x32xf32>
    %31 = arith.addf %29, %30 : vector<16x32xf32>
    %cst_29 = arith.constant 0.000000e+00 : f32
    %32 = vector.broadcast %cst_29 : f32 to vector<16x32xf32>
    %33 = arith.maximumf %31, %32 : vector<16x32xf32>
    %c0_30 = arith.constant 0 : index
    %c0_31 = arith.constant 0 : index
    %c0_32 = arith.constant 0 : index
    %34 = vector.load %arg3[%c0_30, %c0_31, %c0_32] : memref<1x2x16xf32, #tpu.memory_space<vmem>>, vector<1x2x16xf32>
    %35 = vector.shape_cast %34 : vector<1x2x16xf32> to vector<2x16xf32>
    %cst_33 = arith.constant dense<0.000000e+00> : vector<2x32xf32>
    %36 = tpu.matmul %35, %33, %cst_33 {dimension_numbers = #tpu.dot_dimension_numbers<[1], [0], [0], [1], [0, 0, 1, 1], [], []>} : vector<2x16xf32>, vector<16x32xf32>, vector<2x32xf32> -> vector<2x32xf32>
    %c0_34 = arith.constant 0 : index
    %c0_35 = arith.constant 0 : index
    %37 = vector.load %arg12[%c0_34, %c0_35] : memref<32x4xf32, #tpu.memory_space<vmem>>, vector<32x4xf32>
    %cst_36 = arith.constant dense<0.000000e+00> : vector<2x4xf32>
    %38 = tpu.matmul %36, %37, %cst_36 {dimension_numbers = #tpu.dot_dimension_numbers<[1], [0], [0], [1], [0, 0, 1, 1], [], []>} : vector<2x32xf32>, vector<32x4xf32>, vector<2x4xf32> -> vector<2x4xf32>
    %c0_37 = arith.constant 0 : index
    %c0_38 = arith.constant 0 : index
    %39 = vector.load %arg13[%c0_37, %c0_38] : memref<1x4xf32, #tpu.memory_space<vmem>>, vector<1x4xf32>
    %40 = vector.broadcast %39 : vector<1x4xf32> to vector<2x4xf32>
    %41 = arith.addf %38, %40 : vector<2x4xf32>
    %cst_39 = arith.constant dense<0xFF800000> : vector<2xf32>
    %42 = vector.multi_reduction <maximumf>, %41, %cst_39 [1] : vector<2x4xf32> to vector<2xf32>
    %43 = vector.shape_cast %42 : vector<2xf32> to vector<2x1xf32>
    %44 = vector.broadcast %43 : vector<2x1xf32> to vector<2x4xf32>
    %45 = arith.subf %41, %44 : vector<2x4xf32>
    %46 = math.exp %45 : vector<2x4xf32>
    %cst_40 = arith.constant dense<0.000000e+00> : vector<2xf32>
    %47 = vector.multi_reduction <add>, %46, %cst_40 [1] : vector<2x4xf32> to vector<2xf32>
    %48 = vector.shape_cast %47 : vector<2xf32> to vector<2x1xf32>
    %49 = math.log %48 : vector<2x1xf32>
    %50 = vector.broadcast %49 : vector<2x1xf32> to vector<2x4xf32>
    %51 = arith.subf %45, %50 : vector<2x4xf32>
    %c0_41 = arith.constant 0 : index
    %c0_42 = arith.constant 0 : index
    %c0_43 = arith.constant 0 : index
    %52 = vector.load %arg14[%c0_41, %c0_42, %c0_43] : memref<1x2x4xf32, #tpu.memory_space<vmem>>, vector<1x2x4xf32>
    %53 = vector.shape_cast %52 : vector<1x2x4xf32> to vector<2x4xf32>
    %54 = vector.shape_cast %51 : vector<2x4xf32> to vector<1x2x4xf32>
    tpu.vector_store %arg14[%c0_41, %c0_42, %c0_43], %54 {strides = array<i32>} : memref<1x2x4xf32, #tpu.memory_space<vmem>>, vector<1x2x4xf32>,
    return
  }
  func.func @transform_0(%arg0: i32) -> (i32, i32, i32) {
    %c0_i32 = arith.constant 0 : i32
    %c0_i32_0 = arith.constant 0 : i32
    %c0_i32_1 = arith.constant 0 : i32
    return %arg0, %c0_i32, %c0_i32_0 : i32, i32, i32
  }
  func.func @transform_1(%arg0: i32) -> (i32, i32, i32) {
    %c0_i32 = arith.constant 0 : i32
    %c0_i32_0 = arith.constant 0 : i32
    %c0_i32_1 = arith.constant 0 : i32
    return %arg0, %c0_i32, %c0_i32_0 : i32, i32, i32
  }
  func.func @transform_2(%arg0: i32) -> (i32, i32, i32) {
    %c0_i32 = arith.constant 0 : i32
    %c0_i32_0 = arith.constant 0 : i32
    %c0_i32_1 = arith.constant 0 : i32
    return %arg0, %c0_i32, %c0_i32_0 : i32, i32, i32
  }
  func.func @transform_3(%arg0: i32) -> (i32, i32) {
    %c0_i32 = arith.constant 0 : i32
    %c0_i32_0 = arith.constant 0 : i32
    %c0_i32_1 = arith.constant 0 : i32
    return %c0_i32, %c0_i32_0 : i32, i32
  }
  func.func @transform_4(%arg0: i32) -> (i32, i32) {
    %c0_i32 = arith.constant 0 : i32
    %c0_i32_0 = arith.constant 0 : i32
    %c0_i32_1 = arith.constant 0 : i32
    return %c0_i32, %c0_i32_0 : i32, i32
  }
  func.func @transform_5(%arg0: i32) -> (i32, i32) {
    %c0_i32 = arith.constant 0 : i32
    %c0_i32_0 = arith.constant 0 : i32
    %c0_i32_1 = arith.constant 0 : i32
    return %c0_i32, %c0_i32_0 : i32, i32
  }
  func.func @transform_6(%arg0: i32) -> (i32, i32) {
    %c0_i32 = arith.constant 0 : i32
    %c0_i32_0 = arith.constant 0 : i32
    %c0_i32_1 = arith.constant 0 : i32
    return %c0_i32, %c0_i32_0 : i32, i32
  }
  func.func @transform_7(%arg0: i32) -> (i32, i32) {
    %c0_i32 = arith.constant 0 : i32
    %c0_i32_0 = arith.constant 0 : i32
    %c0_i32_1 = arith.constant 0 : i32
    return %c0_i32, %c0_i32_0 : i32, i32
  }
  func.func @transform_8(%arg0: i32) -> (i32, i32) {
    %c0_i32 = arith.constant 0 : i32
    %c0_i32_0 = arith.constant 0 : i32
    %c0_i32_1 = arith.constant 0 : i32
    return %c0_i32, %c0_i32_0 : i32, i32
  }
  func.func @transform_9(%arg0: i32) -> (i32, i32) {
    %c0_i32 = arith.constant 0 : i32
    %c0_i32_0 = arith.constant 0 : i32
    %c0_i32_1 = arith.constant 0 : i32
    return %c0_i32, %c0_i32_0 : i32, i32
  }
  func.func @transform_10(%arg0: i32) -> (i32, i32) {
    %c0_i32 = arith.constant 0 : i32
    %c0_i32_0 = arith.constant 0 : i32
    %c0_i32_1 = arith.constant 0 : i32
    return %c0_i32, %c0_i32_0 : i32, i32
  }
  func.func @transform_11(%arg0: i32) -> (i32, i32) {
    %c0_i32 = arith.constant 0 : i32
    %c0_i32_0 = arith.constant 0 : i32
    %c0_i32_1 = arith.constant 0 : i32
    return %c0_i32, %c0_i32_0 : i32, i32
  }
  func.func @transform_12(%arg0: i32) -> (i32, i32) {
    %c0_i32 = arith.constant 0 : i32
    %c0_i32_0 = arith.constant 0 : i32
    %c0_i32_1 = arith.constant 0 : i32
    return %c0_i32, %c0_i32_0 : i32, i32
  }
  func.func @transform_13(%arg0: i32) -> (i32, i32, i32) {
    %c0_i32 = arith.constant 0 : i32
    %c0_i32_0 = arith.constant 0 : i32
    %c0_i32_1 = arith.constant 0 : i32
    return %arg0, %c0_i32, %c0_i32_0 : i32, i32, i32
  }
}

</mosaic_0001>

<bundles_post_ra>
// kernel: gnn_forward.1
= control target key start
LH: loop header
LB: loop body
LE: loop exit
PB: predicated region body
PF: predicated region fallthrough
CT: control target
= control target key end

     0   :  { %s1539_s25 = smov 0   ;;  %s1651_s0 = inlined_call_operand.vmem [shape: f32[8,16,8], index: 0, kind: input, shape index: {}]   ;;  %s1652_s1 = inlined_call_operand.vmem [shape: f32[8,16,16], index: 1, kind: input, shape index: {}]   ;;  %s1653_s2 = inlined_call_operand.vmem [shape: f32[8,2,16], index: 2, kind: input, shape index: {}]   ;;  %s1654_s3 = inlined_call_operand.vmem [shape: f32[8,32], index: 3, kind: input, shape index: {}]   ;;  %s1655_s4 = inlined_call_operand.vmem [shape: f32[1,32], index: 4, kind: input, shape index: {}]   ;;  %s1656_s5 = inlined_call_operand.vmem [shape: f32[32,32], index: 5, kind: input, shape index: {}]   ;;  %s1657_s6 = inlined_call_operand.vmem [shape: f32[1,32], index: 6, kind: input, shape index: {}]   ;;  %s1658_s7 = inlined_call_operand.vmem [shape: f32[32,32], index: 7, kind: input, shape index: {}]   ;;  %s1659_s8 = inlined_call_operand.vmem [shape: f32[1,32], index: 8, kind: input, shape index: {}]   ;;  %s1660_s9 = inlined_call_operand.vmem [shape: f32[32,32], index: 9, kind: input, shape index: {}]   ;;  %s1661_s10 = inlined_call_operand.vmem [shape: f32[1,32], index: 10, kind: input, shape index: {}]   ;;  %s1662_s11 = inlined_call_operand.vmem [shape: f32[32,4], index: 11, kind: input, shape index: {}]   ;;  %s1663_s12 = inlined_call_operand.vmem [shape: f32[1,4], index: 12, kind: input, shape index: {}]   ;;  %s1664_s13 = inlined_call_operand.vmem [shape: f32[8,2,4], index: 13, kind: output, shape index: {}]  }
   0x1 LB: > { %s1261_s26 = sadd.s32 4294967295, %s1464_s25   ;;  %p1265_p0 = scmp.ge.s32.totalorder %s1464_s25, 1  ;;  %s1464_s25 = sphi %s1539_s25, %s23_s25  }
   0x2   : > { %p406_p1 = scmp.lt.s32.totalorder %s1464_s25, 9 }
   0x4   : > { %p407_p2 = pnand %p1265_p0, %p406_p1 }
   0x5   : > { %p458_p3 = scmp.lt.s32.totalorder (!%p407_p2), %s1261_s26, 7  ;;  %vm487_vm0 = vcmask (!%p407_p2), 130048   ;;  %v480_v4 = vld [vmem:[%s1654_s3] sm:$0xff] (!%p407_p2)  ;;  %v483_v7 = vld [vmem:[%s1656_s5 + $0x8] sm:$0xff] (!%p407_p2)  ;;  %vm575_vm1 = vcmask (!%p407_p2), 64512   ;;  %v484_v11 = vld [vmem:[%s1656_s5 + $0x10] sm:$0xff] (!%p407_p2) }
   0x6   : > { %410 = sbr.rel (%p407_p2) target bundleno = 2075 (0x81b), region = 72  ;;  %v482_v6 = vld [vmem:[%s1656_s5] sm:$0xff] (!%p407_p2)  ;;  %v485_v12 = vld [vmem:[%s1656_s5 + $0x18] sm:$0xff] (!%p407_p2)  ;;  %vm665_vm2 = vcmask (!%p407_p2), 261120   ;;  %v750_v28 = vld [vmem:[%s1658_s7 + $0x8] sm:$0xff] (!%p407_p2)  ;;  %v1466_v50 = vmov (!%p407_p2), 0.0|0.0  }
   0x7   : > { %v1406_v8 = vpack.c.bf16 (!%p407_p2), %v483_v7, %v482_v6  ;;  %v1410_v13 = vpack.c.bf16 (!%p407_p2), %v485_v12, %v484_v11  ;;  %v1274_v14 = vld [vmem:[%s1655_s4] ss:$0 sm:$0xff] (!%p407_p2)  ;;  %v751_v32 = vld [vmem:[%s1658_s7 + $0x10] sm:$0xff] (!%p407_p2)  ;;  %v752_v33 = vld [vmem:[%s1658_s7 + $0x18] sm:$0xff] (!%p407_p2)  ;;  %vm1467_vm3 = vmmov (!%p407_p2), 0   ;;  %v1468_v51 = vmov (!%p407_p2), 0.0  }
   0x8   : > { %v1277_v21 = vld [vmem:[%s1657_s6] ss:$0 sm:$0xff] (!%p407_p2)  ;;  %v1422_v34 = vpack.c.bf16 (!%p407_p2), %v752_v33, %v751_v32  ;;  %v755_v36 = vld [vmem:[%s1660_s9 + $0x8] sm:$0xff] (!%p407_p2)  ;;  %v756_v40 = vld [vmem:[%s1660_s9 + $0x10] sm:$0xff] (!%p407_p2)  ;;  %vm1170_vm4 = vcmask (!%p407_p2), 25600  }
   0x9   : > { %1407 = vmatprep.subr.bf16.mxu1 (!%p407_p2), %v1406_v8  ;;  %v749_v27 = vld [vmem:[%s1658_s7] sm:$0xff] (!%p407_p2)  ;;  %v757_v41 = vld [vmem:[%s1660_s9 + $0x18] sm:$0xff] (!%p407_p2)  ;;  %v1087_v53 = vld [vmem:[%s1662_s11 + $0x8] sm:$0xff] (!%p407_p2) }
   0xa   : > { %1409 = vmatpush3.bf16.msra.mxu1 (!%p407_p2), %v1406_v8  ;;  %v1418_v31 = vpack.c.bf16 (!%p407_p2), %v750_v28, %v749_v27  ;;  %v754_v35 = vld [vmem:[%s1660_s9] sm:$0xff] (!%p407_p2)  ;;  %v1430_v42 = vpack.c.bf16 (!%p407_p2), %v757_v41, %v756_v40  ;;  %v1088_v54 = vld [vmem:[%s1662_s11 + $0x10] sm:$0xff] (!%p407_p2)  ;;  %v1089_v56 = vld [vmem:[%s1662_s11 + $0x18] sm:$0xff] (!%p407_p2) }
   0xb   : > { %1411 = vmatprep.subr.bf16.mxu1 (!%p407_p2), %v1410_v13  ;;  %v1426_v37 = vpack.c.bf16 (!%p407_p2), %v755_v36, %v754_v35  ;;  %v1282_v43 = vld [vmem:[%s1659_s8] ss:$0 sm:$0xff] (!%p407_p2)  ;;  %v1441_v57 = vpack.c.bf16 (!%p407_p2), %v1089_v56, %v1088_v54 }
   0xc   : > { %v1086_v52 = vld [vmem:[%s1662_s11] sm:$0xff] (!%p407_p2) }
   0xd   : > { %s1666_s26 = smov (!%p458_p3, %s1261_s26), 7  ;;  %v1438_v55 = vpack.c.bf16 %v1087_v53, %v1086_v52  ;;  %v1285_v58 = vld [vmem:[%s1661_s10] ss:$0 sm:$0xff] }
   0xe   : > { %s1293_s27 = sshll.u32 %s1666_s26, 4  ;;  %1413 = vmatpush3.bf16.msra.mxu1 %v1410_v13  ;;  %s1270_s14 = sshll.u32 %s1666_s26, 1 }
   0xf   : > { %s462_s30 = scalar_lea.vmem %s1651_s0, %s1293_s27  ;;  %s467_s16 = scalar_lea.vmem %s1652_s1, %s1293_s27  ;;  %1427 = vmatprep.subr.bf16.mxu1 %v1426_v37 }
  0x10   : > { %v478_v0 = vld [vmem:[%s462_s30] sm:$0xff]  ;;  %v479_v1 = vld [vmem:[%s462_s30 + $0x8] sm:$0xff]  ;;  %s471_s17 = scalar_lea.vmem %s1653_s2, %s1270_s14  ;;  %s475_s22 = scalar_lea.vmem %s1664_s13, %s1270_s14 }
  0x11   : > { %v476_v2 = vld [vmem:[%s467_s16] sm:$0xff]  ;;  %v1402_v3 = vpack.c.bf16 %v479_v1, %v478_v0  ;;  %v477_v5 = vld [vmem:[%s467_s16 + $0x8] sm:$0xff] }
  0x12   : > { %1336 = vmatprep.mubr.msk.f32.mxu0 %vm487_vm0, %v476_v2 }
  0x13   : > { %1403 = vmatprep.subr.bf16.mxu0 %v1402_v3 }
  0x14   : > { %1405 = vmatpush3.bf16.msra.mxu0 %v1402_v3 }
  0x15   : > { %1339 = vmatprep.subr.mxu0 %v480_v4 }
  0x17   : > { %1337 = vmatmul.mubr.msk.f32.vlgmr.msra.gmra.mrb[0].mxu0 %vm487_vm0, %v477_v5 }
  0x18   : > { %1340 = vmatpush3.msra.mxu0 %v480_v4 }
  0xea   : > { %v1338_v9 = vpop.f32.mrb[0].mxu0 }
  0xeb   : > { %v560_v10 = vpop.f32.mrb[1].mxu0 }
  0xec   : > { %1341 = vmatprep.mubr.msk.f32.mxu0 %vm575_vm1, %v560_v10 }
  0xed   : > { %1342 = vmatmul.mubr.msk.f32.vlgmr.msra.gmra.mrb[2].mxu0 %vm575_vm1, %v1338_v9 }
  0xee   : > { %1359 = vmatprep.mubr.msk.f32.mxu0 %vm487_vm0, %v476_v2  ;;  %v1012_v2 = vld [vmem:[%s471_s17] sm:$0x3] }
 0x1c0   : > { %v1343_v15 = vpop.f32.mrb[2].mxu0 }
 0x1c1   : > { %v654_v16 = vadd.f32 %v1343_v15, %v1274_v14  ;;  %v648_v17 = vpop.f32.mrb[3].mxu0 }
 0x1c2   : > { %v649_v18 = vadd.f32 %v1274_v14, %v648_v17 }
 0x1c3   : > { %v658_v20 = vmax.f32 %v654_v16, 0.0 }
 0x1c4   : > { %v657_v19 = vmax.f32 %v649_v18, 0.0 }
 0x1c6   : > { %1352 = vmatprep.mubr.msk.f32.mxu1 %vm665_vm2, %v657_v19 }
 0x1c7   : > { %1353 = vmatmul.mubr.msk.f32.vlgmr.msra.gmra.mrb[0].mxu1 %vm665_vm2, %v658_v20 }
 0x1c8   : > { %1429 = vmatpush3.bf16.msra.mxu1 %v1426_v37 }
 0x1c9   : > { %1431 = vmatprep.subr.bf16.mxu1 %v1430_v42 }
 0x1cc   : > { %1433 = vmatpush3.bf16.msra.mxu1 %v1430_v42 }
 0x1cd   : > { %1437 = vmatprep.subr.bf16.mxu1 %v1466_v50 }
 0x29a   : > { %v1354_v22 = vpop.f32.mrb[0].mxu1 }
 0x29b   : > { %v744_v23 = vadd.f32 %v1354_v22, %v1277_v21  ;;  %v738_v24 = vpop.f32.mrb[1].mxu1 }
 0x29c   : > { %v739_v25 = vadd.f32 %v1277_v21, %v738_v24 }
 0x29d   : > { %v748_v26 = vmax.f32 %v744_v23, 0.0 }
 0x29e   : > { %v747_v29 = vmax.f32 %v739_v25, 0.0 }
 0x2a0   : > { %v1414_v30 = vpack.c.bf16 %v748_v26, %v747_v29 }
 0x2a2   : > { %1415 = vmatprep.subr.bf16.mxu0 %v1414_v30 }
 0x2a3   : > { %1417 = vmatpush3.bf16.msra.mxu0 %v1414_v30 }
 0x2a4   : > { %1419 = vmatprep.subr.bf16.mxu0 %v1418_v31 }
 0x2a6   : > { %1360 = vmatmul.mubr.msk.f32.vlgmr.msra.gmra.mrb[4].mxu0 %vm487_vm0, %v477_v5  ;;  %v1289_v5 = vld [vmem:[%s1663_s12] ss:$0 sm:$0xff] }
 0x2a7   : > { %1421 = vmatpush3.bf16.msra.mxu0 %v1418_v31 }
 0x2a8   : > { %1423 = vmatprep.subr.bf16.mxu0 %v1422_v34 }
 0x2ab   : > { %1425 = vmatpush3.bf16.msra.mxu0 %v1422_v34 }
 0x2ac   : > { %1434 = vmatprep.subr.bf16.mxu0 %v1466_v50 }
 0x379   : > { %v1361_v38 = vpop.f32.mrb[4].mxu0 }
 0x37a   : > { %v825_v39 = vpop.f32.mrb[5].mxu0 }
 0x37b   : > { %1370 = vmatprep.mubr.msk.f32.mxu0 %vm665_vm2, %v825_v39 }
 0x37c   : > { %1371 = vmatmul.mubr.msk.f32.vlgmr.msra.gmra.mrb[6].mxu0 %vm665_vm2, %v1361_v38 }
 0x37d   : > { %1388 = vmatprep.mubr.msk.f32.mxu0 %vm1467_vm3, %v1468_v51 }
 0x44f   : > { %v1372_v44 = vpop.f32.mrb[6].mxu0 }
 0x450   : > { %v918_v45 = vadd.f32 %v1372_v44, %v1282_v43  ;;  %v912_v46 = vpop.f32.mrb[7].mxu0 }
 0x451   : > { %v913_v47 = vadd.f32 %v1282_v43, %v912_v46 }
 0x452   : > { %v922_v49 = vmax.f32 %v918_v45, 0.0 }
 0x453   : > { %v921_v48 = vmax.f32 %v913_v47, 0.0 }
 0x455   : > { %1381 = vmatprep.mubr.msk.f32.mxu1 %vm665_vm2, %v921_v48 }
 0x456   : > { %1382 = vmatmul.mubr.msk.f32.vlgmr.msra.gmra.mrb[2].mxu1 %vm665_vm2, %v922_v49 }
 0x457   : > { %1399 = vmatprep.mubr.msk.f32.mxu1 %vm1467_vm3, %v1468_v51  ;;  %1439 = vmatpush3.bf16.msra.mxu1 %v1438_v55 }
 0x458   : > { %1440 = vmatprep.subr.bf16.mxu1 %v1466_v50 }
 0x45b   : > { %1442 = vmatpush3.bf16.msra.mxu1 %v1441_v57 }
 0x529   : > { %v1383_v59 = vpop.f32.mrb[2].mxu1 }
 0x52a   : > { %v1007_v60 = vadd.f32 %v1383_v59, %v1285_v58  ;;  %v1001_v61 = vpop.f32.mrb[3].mxu1 }
 0x52b   : > { %v1002_v62 = vadd.f32 %v1285_v58, %v1001_v61 }
 0x52c   : > { %v1011_v63 = vmax.f32 %v1007_v60, 0.0 }
 0x52d   : > { %v1010_v0 = vmax.f32 %v1002_v62, 0.0 }
 0x52f   : > { %v1435_v1 = vpack.c.bf16 %v1011_v63, %v1010_v0 }
 0x531   : > { %1436 = vmatpush3.bf16.msra.mxu0 %v1435_v1 }
 0x534   : > { %1389 = vmatmul.mubr.msk.f32.vlgmr.msra.gmra.mrb[8].mxu0 %vm487_vm0, %v1012_v2 }
 0x607   : > { %v1082_v3 = vpop.f32.mrb[8].mxu0 }
 0x608   : > { %v1390_v4 = vpop.f32.mrb[9].mxu0  ;;  %1400 = vmatmul.mubr.msk.f32.vlgmr.msra.gmra.mrb[4].mxu1 %vm665_vm2, %v1082_v3 }
 0x6db   : > { %v1166_v6 = vpop.f32.mrb[4].mxu1 }
 0x6dc   : > { %v1167_v7 = vadd.f32 %v1289_v5, %v1166_v6  ;;  %v1401_v8 = vpop.f32.mrb[5].mxu1 }
 0x6de   : > { %v1171_v9 = vsel %vm1170_vm4, %v1167_v7, -inf }
 0x6df   : > { %1172 = vmax.xlane.f32.xlu0 %v1171_v9 }
 0x76c   : > { %v1173_v10 = vpop.xlane.xlu0 %1172 }
 0x76d   : > { %v1174_v11 = vsub.f32 %v1167_v7, %v1173_v10 }
 0x76f   : > { %v1175_v12 = vmul.f32 1.442695, %v1174_v11 }
 0x771   : > { %1454 = vpow2.f32 %v1175_v12 }
 0x77b   : > { %v1455_v13 = vpop.eup %1454 }
 0x77c   : > { %v1177_v14 = vsel %vm1170_vm4, %v1455_v13, 0.0 }
 0x77d   : > { %1178 = vadd.xlane.f32.xlu0 %v1177_v14 }
 0x80a   : > { %v1179_v15 = vpop.xlane.xlu0 %1178 }
 0x80b   : > { %1456 = vlog2.f32 %v1179_v15 }
 0x815   : > { %v1457_v16 = vpop.eup %1456 }
 0x816   : > { %v1181_v17 = vmul.f32 0.6931472, %v1457_v16 }
 0x818   : > { %v1182_v18 = vsub.f32 %v1174_v11, %v1181_v17 }
 0x81a   : > { %1183 = vst.msk [vmem:[%s475_s22] sm:$0x3] %vm1170_vm4, %v1182_v18 }
 0x81b PF: > { %s23_s25 = sadd.s32 1, %s1464_s25  }
 0x81c   : > { %p20_p4 = scmp.ge.s32.totalorder %s23_s25, 10  }
 0x81e   :  { %22 = sbr.rel (!%p20_p4) target bundleno = 1 (0x1), region = 108 }

</bundles_post_ra>
